<compile_context>
chip_gen: v5e
topology: v5e:2x2
jax: 0.10.0
libtpu: 0.0.40
codegen_flags: <defaults>
</compile_context>

<pallas_src>
import functools

import numpy as np
import jax
import jax.numpy as jnp
from jax.experimental import pallas as pl
from jax.experimental.pallas import tpu as pltpu


# ----------------------------- Pallas kernel --------------------------------
def dqn_kernel(
    x_ref,        # (BT, S)
    w1_ref,       # (S, H)        feature_layer weight
    b1_ref,       # (1, H)        feature_layer bias
    wh_ref,       # (H, 2H)       [advantage_hidden | value_hidden] (noisy, folded)
    bh_ref,       # (1, 2H)
    whead_ref,    # (2H, A*Z)     [wa @ (I - mean) ; wv @ tile]   (noisy, folded)
    bhead_ref,    # (1, A*Z)
    sup_ref,      # (1, Z)        distribution support
    o_ref,        # (BT, A)
    *,
    action_dim,
    atom_size,
):
    x = x_ref[...]

    # feature = ReLU(Linear(state_dim, hidden))
    feature = jnp.maximum(
        jnp.dot(x, w1_ref[...], preferred_element_type=jnp.float32) + b1_ref[...], 0.0)

    # adv_hid / val_hid computed as ONE fused (H, 2H) matmul, kept concatenated.
    hid = jnp.maximum(
        jnp.dot(feature, wh_ref[...], preferred_element_type=jnp.float32) + bh_ref[...], 0.0)

    # q_atoms = value_broadcast + advantage - advantage.mean(actions); the constant
    # mean/broadcast structure is pre-folded into whead/bhead by the wrapper.
    q_atoms = jnp.dot(hid, whead_ref[...], preferred_element_type=jnp.float32) + bhead_ref[...]

    # Per-action-block softmax over the atom axis (exact per-block max shift) followed by
    # clamp(min=0.001) and the support-weighted sum.  A is small and static, so this loop
    # unrolls fully at trace time.
    Z = atom_size
    sup = sup_ref[...]                                        # (1, Z)
    q_cols = []
    for a in range(action_dim):
        blk = q_atoms[:, a * Z:(a + 1) * Z]
        blk = blk - jnp.max(blk, axis=-1, keepdims=True)
        e = jnp.exp(blk)
        inv = pl.reciprocal(jnp.sum(e, axis=-1, keepdims=True), approx=False)
        dist = jnp.maximum(e * inv, 0.001)                    # torch .clamp(min=0.001)
        q_cols.append(jnp.sum(dist * sup, axis=-1, keepdims=True))   # (BT, 1)
    o_ref[...] = jnp.concatenate(q_cols, axis=-1)             # (BT, A)


# ------------------------------- wrapper -------------------------------------
def dqn_forward(x, params, support, action_dim, atom_size, *, batch_tile=128):
    (w1, b1, wah, bah, wvh, bvh, wa, ba, wv, bv) = params
    A, Z = action_dim, atom_size
    AZ = A * Z
    f32 = jnp.float32

    # ---- fold the dueling/distributional constants into the head weights (one-time) ----
    eye_z = jnp.eye(Z, dtype=f32)
    m_mean = jnp.tile(eye_z / A, (A, A))                  # (AZ, AZ) mean over action blocks
    proj = jnp.eye(AZ, dtype=f32) - m_mean                # advantage - mean(advantage)
    t_val = jnp.tile(eye_z, (1, A))                       # (Z, AZ)  value tiled across actions

    wa_eff = wa @ proj
    ba_eff = ba @ proj
    wv_eff = wv @ t_val
    bv_eff = bv @ t_val

    w_hid = jnp.concatenate([wah, wvh], axis=1)           # (H, 2H)
    b_hid = jnp.concatenate([bah, bvh], axis=1)           # (1, 2H)
    w_head = jnp.concatenate([wa_eff, wv_eff], axis=0)    # (2H, AZ)
    b_head = ba_eff + bv_eff                               # (1, AZ)

    sup_row = support.reshape(1, Z).astype(f32)            # (1, Z)

    # ---- batch grid: weights resident, batch tiles pipelined / core-parallel ----
    B, S = x.shape
    bt = min(batch_tile, ((B + 7) // 8) * 8)               # sublane-aligned batch tile
    pad = (-B) % bt
    x_p = jnp.pad(x, ((0, pad), (0, 0))) if pad else x
    Bp = B + pad

    resident = lambda i: (0, 0)   # same block every grid step -> stays in VMEM

    kernel = functools.partial(dqn_kernel, action_dim=A, atom_size=Z)
    # TODO(synk): at production hidden sizes, pad S/H/AZ to multiples of 128 for lane-dense
    # MXU/VPU occupancy; at these toy shapes the kernel is overhead-dominated anyway.
    out = pl.pallas_call(
        kernel,
        out_shape=jax.ShapeDtypeStruct((Bp, A), jnp.float32),
        grid=(Bp // bt,),
        in_specs=[
            pl.BlockSpec((bt, S), lambda i: (i, 0)),
            pl.BlockSpec(w1.shape, resident),
            pl.BlockSpec(b1.shape, resident),
            pl.BlockSpec(w_hid.shape, resident),
            pl.BlockSpec(b_hid.shape, resident),
            pl.BlockSpec(w_head.shape, resident),
            pl.BlockSpec(b_head.shape, resident),
            pl.BlockSpec(sup_row.shape, resident),
        ],
        out_specs=pl.BlockSpec((bt, A), lambda i: (i, 0)),
        compiler_params=pltpu.CompilerParams(dimension_semantics=("parallel",)),
    )(x_p, w1, b1, w_hid, b_hid, w_head, b_head, sup_row)

    return out[:B]


# -------------------------- pure-JAX reference --------------------------------
def dqn_reference(x, params, support, action_dim, atom_size):
    (w1, b1, wah, bah, wvh, bvh, wa, ba, wv, bv) = params
    feature = jax.nn.relu(x @ w1 + b1)
    adv_hid = jax.nn.relu(feature @ wah + bah)
    val_hid = jax.nn.relu(feature @ wvh + bvh)
    advantage = (adv_hid @ wa + ba).reshape(-1, action_dim, atom_size)
    value = (val_hid @ wv + bv).reshape(-1, 1, atom_size)
    q_atoms = value + advantage - advantage.mean(axis=1, keepdims=True)
    dist = jax.nn.softmax(q_atoms, axis=-1)
    dist = jnp.maximum(dist, 0.001)                        # torch .clamp(min=0.001)
    return jnp.sum(dist * support, axis=2)


# ------------------------------ param setup -----------------------------------
def make_params(key, state_dim, hidden_dim, action_dim, atom_size):
    """Deterministic synthetic params. NoisyLinear layers are folded into a single
    effective (weight, bias) since forward() only ever uses mu + sigma*eps."""
    def dense(k, fan_in, fan_out):
        kw, kb = jax.random.split(k)
        s = 1.0 / np.sqrt(fan_in)
        w = jax.random.uniform(kw, (fan_in, fan_out), jnp.float32, -s, s)
        b = jax.random.uniform(kb, (1, fan_out), jnp.float32, -s, s)
        return w, b

    ks = jax.random.split(key, 5)
    w1, b1 = dense(ks[0], state_dim, hidden_dim)
    wah, bah = dense(ks[1], hidden_dim, hidden_dim)
    wvh, bvh = dense(ks[2], hidden_dim, hidden_dim)
    wa, ba = dense(ks[3], hidden_dim, action_dim * atom_size)
    wv, bv = dense(ks[4], hidden_dim, atom_size)
    return (w1, b1, wah, bah, wvh, bvh, wa, ba, wv, bv)


if __name__ == "__main__":
    # Small shapes consistent with the module's forward.
    B, STATE_DIM, HIDDEN, ACTIONS, ATOMS = 8, 16, 32, 4, 8

    key = jax.random.PRNGKey(0)
    k_x, k_p = jax.random.split(key)

    x = jax.random.normal(k_x, (B, STATE_DIM), jnp.float32)
    params = make_params(k_p, STATE_DIM, HIDDEN, ACTIONS, ATOMS)
    support = jnp.linspace(-10.0, 10.0, ATOMS, dtype=jnp.float32)  # Rainbow support

    q = dqn_forward(x, params, support, ACTIONS, ATOMS)
    q = jax.block_until_ready(q)

    q_ref = dqn_reference(x, params, support, ACTIONS, ATOMS)
    np.testing.assert_allclose(np.asarray(q), np.asarray(q_ref), rtol=1e-4, atol=1e-4)

    print("KERNEL_OK")
</pallas_src>

<mosaic_0001>
module attributes {stable_mosaic.version = 11 : i64} {
  func.func @dqn_kernel(%arg0: i32, %arg1: memref<8x16xf32, #tpu.memory_space<vmem>>, %arg2: memref<16x32xf32, #tpu.memory_space<vmem>>, %arg3: memref<1x32xf32, #tpu.memory_space<vmem>>, %arg4: memref<32x64xf32, #tpu.memory_space<vmem>>, %arg5: memref<1x64xf32, #tpu.memory_space<vmem>>, %arg6: memref<64x32xf32, #tpu.memory_space<vmem>>, %arg7: memref<1x32xf32, #tpu.memory_space<vmem>>, %arg8: memref<1x8xf32, #tpu.memory_space<vmem>>, %arg9: memref<8x4xf32, #tpu.memory_space<vmem>>) attributes {dimension_semantics = [#tpu.dimension_semantics<parallel>], iteration_bounds = array<i64: 1>, scalar_prefetch = 0 : i64, scratch_operands = 0 : i64, tpu.core_type = #tpu.core_type<tc>, window_params = [{transform_indices = @transform_0, window_bounds = array<i64: 8, 16>}, {pipeline_mode = #tpu.pipeline_mode<synchronous>, transform_indices = @transform_1, window_bounds = array<i64: 16, 32>}, {pipeline_mode = #tpu.pipeline_mode<synchronous>, transform_indices = @transform_2, window_bounds = array<i64: 1, 32>}, {pipeline_mode = #tpu.pipeline_mode<synchronous>, transform_indices = @transform_3, window_bounds = array<i64: 32, 64>}, {pipeline_mode = #tpu.pipeline_mode<synchronous>, transform_indices = @transform_4, window_bounds = array<i64: 1, 64>}, {pipeline_mode = #tpu.pipeline_mode<synchronous>, transform_indices = @transform_5, window_bounds = array<i64: 64, 32>}, {pipeline_mode = #tpu.pipeline_mode<synchronous>, transform_indices = @transform_6, window_bounds = array<i64: 1, 32>}, {pipeline_mode = #tpu.pipeline_mode<synchronous>, transform_indices = @transform_7, window_bounds = array<i64: 1, 8>}, {transform_indices = @transform_8, window_bounds = array<i64: 8, 4>}]} {
    %c0 = arith.constant 0 : index
    %c0_0 = arith.constant 0 : index
    %0 = vector.load %arg1[%c0, %c0_0] : memref<8x16xf32, #tpu.memory_space<vmem>>, vector<8x16xf32>
    %c0_1 = arith.constant 0 : index
    %c0_2 = arith.constant 0 : index
    %1 = vector.load %arg2[%c0_1, %c0_2] : memref<16x32xf32, #tpu.memory_space<vmem>>, vector<16x32xf32>
    %cst = arith.constant dense<0.000000e+00> : vector<8x32xf32>
    %2 = tpu.matmul %0, %1, %cst {dimension_numbers = #tpu.dot_dimension_numbers<[1], [0], [0], [1], [0, 0, 1, 1], [], []>} : vector<8x16xf32>, vector<16x32xf32>, vector<8x32xf32> -> vector<8x32xf32>
    %c0_3 = arith.constant 0 : index
    %c0_4 = arith.constant 0 : index
    %3 = vector.load %arg3[%c0_3, %c0_4] : memref<1x32xf32, #tpu.memory_space<vmem>>, vector<1x32xf32>
    %4 = vector.broadcast %3 : vector<1x32xf32> to vector<8x32xf32>
    %5 = arith.addf %2, %4 : vector<8x32xf32>
    %cst_5 = arith.constant 0.000000e+00 : f32
    %6 = vector.broadcast %cst_5 : f32 to vector<8x32xf32>
    %7 = arith.maximumf %5, %6 : vector<8x32xf32>
    %c0_6 = arith.constant 0 : index
    %c0_7 = arith.constant 0 : index
    %8 = vector.load %arg4[%c0_6, %c0_7] : memref<32x64xf32, #tpu.memory_space<vmem>>, vector<32x64xf32>
    %cst_8 = arith.constant dense<0.000000e+00> : vector<8x64xf32>
    %9 = tpu.matmul %7, %8, %cst_8 {dimension_numbers = #tpu.dot_dimension_numbers<[1], [0], [0], [1], [0, 0, 1, 1], [], []>} : vector<8x32xf32>, vector<32x64xf32>, vector<8x64xf32> -> vector<8x64xf32>
    %c0_9 = arith.constant 0 : index
    %c0_10 = arith.constant 0 : index
    %10 = vector.load %arg5[%c0_9, %c0_10] : memref<1x64xf32, #tpu.memory_space<vmem>>, vector<1x64xf32>
    %11 = vector.broadcast %10 : vector<1x64xf32> to vector<8x64xf32>
    %12 = arith.addf %9, %11 : vector<8x64xf32>
    %cst_11 = arith.constant 0.000000e+00 : f32
    %13 = vector.broadcast %cst_11 : f32 to vector<8x64xf32>
    %14 = arith.maximumf %12, %13 : vector<8x64xf32>
    %c0_12 = arith.constant 0 : index
    %c0_13 = arith.constant 0 : index
    %15 = vector.load %arg6[%c0_12, %c0_13] : memref<64x32xf32, #tpu.memory_space<vmem>>, vector<64x32xf32>
    %cst_14 = arith.constant dense<0.000000e+00> : vector<8x32xf32>
    %16 = tpu.matmul %14, %15, %cst_14 {dimension_numbers = #tpu.dot_dimension_numbers<[1], [0], [0], [1], [0, 0, 1, 1], [], []>} : vector<8x64xf32>, vector<64x32xf32>, vector<8x32xf32> -> vector<8x32xf32>
    %c0_15 = arith.constant 0 : index
    %c0_16 = arith.constant 0 : index
    %17 = vector.load %arg7[%c0_15, %c0_16] : memref<1x32xf32, #tpu.memory_space<vmem>>, vector<1x32xf32>
    %18 = vector.broadcast %17 : vector<1x32xf32> to vector<8x32xf32>
    %19 = arith.addf %16, %18 : vector<8x32xf32>
    %c0_17 = arith.constant 0 : index
    %c0_18 = arith.constant 0 : index
    %20 = vector.load %arg8[%c0_17, %c0_18] : memref<1x8xf32, #tpu.memory_space<vmem>>, vector<1x8xf32>
    %21 = vector.extract_strided_slice %19 {offsets = [0, 0], sizes = [8, 8], strides = [1, 1]} : vector<8x32xf32> to vector<8x8xf32>
    %cst_19 = arith.constant dense<0xFF800000> : vector<8xf32>
    %22 = vector.multi_reduction <maximumf>, %21, %cst_19 [1] : vector<8x8xf32> to vector<8xf32>
    %23 = vector.shape_cast %22 : vector<8xf32> to vector<8x1xf32>
    %24 = vector.broadcast %23 : vector<8x1xf32> to vector<8x8xf32>
    %25 = arith.subf %21, %24 : vector<8x8xf32>
    %26 = math.exp %25 : vector<8x8xf32>
    %cst_20 = arith.constant dense<0.000000e+00> : vector<8xf32>
    %27 = vector.multi_reduction <add>, %26, %cst_20 [1] : vector<8x8xf32> to vector<8xf32>
    %28 = vector.shape_cast %27 : vector<8xf32> to vector<8x1xf32>
    %29 = tpu.reciprocal %28 : vector<8x1xf32> -> vector<8x1xf32>
    %30 = vector.broadcast %29 : vector<8x1xf32> to vector<8x8xf32>
    %31 = arith.mulf %26, %30 : vector<8x8xf32>
    %cst_21 = arith.constant 1.000000e-03 : f32
    %32 = vector.broadcast %cst_21 : f32 to vector<8x8xf32>
    %33 = arith.maximumf %31, %32 : vector<8x8xf32>
    %34 = vector.broadcast %20 : vector<1x8xf32> to vector<8x8xf32>
    %35 = arith.mulf %33, %34 : vector<8x8xf32>
    %cst_22 = arith.constant dense<0.000000e+00> : vector<8xf32>
    %36 = vector.multi_reduction <add>, %35, %cst_22 [1] : vector<8x8xf32> to vector<8xf32>
    %37 = vector.shape_cast %36 : vector<8xf32> to vector<8x1xf32>
    %38 = vector.extract_strided_slice %19 {offsets = [0, 8], sizes = [8, 8], strides = [1, 1]} : vector<8x32xf32> to vector<8x8xf32>
    %cst_23 = arith.constant dense<0xFF800000> : vector<8xf32>
    %39 = vector.multi_reduction <maximumf>, %38, %cst_23 [1] : vector<8x8xf32> to vector<8xf32>
    %40 = vector.shape_cast %39 : vector<8xf32> to vector<8x1xf32>
    %41 = vector.broadcast %40 : vector<8x1xf32> to vector<8x8xf32>
    %42 = arith.subf %38, %41 : vector<8x8xf32>
    %43 = math.exp %42 : vector<8x8xf32>
    %cst_24 = arith.constant dense<0.000000e+00> : vector<8xf32>
    %44 = vector.multi_reduction <add>, %43, %cst_24 [1] : vector<8x8xf32> to vector<8xf32>
    %45 = vector.shape_cast %44 : vector<8xf32> to vector<8x1xf32>
    %46 = tpu.reciprocal %45 : vector<8x1xf32> -> vector<8x1xf32>
    %47 = vector.broadcast %46 : vector<8x1xf32> to vector<8x8xf32>
    %48 = arith.mulf %43, %47 : vector<8x8xf32>
    %cst_25 = arith.constant 1.000000e-03 : f32
    %49 = vector.broadcast %cst_25 : f32 to vector<8x8xf32>
    %50 = arith.maximumf %48, %49 : vector<8x8xf32>
    %51 = vector.broadcast %20 : vector<1x8xf32> to vector<8x8xf32>
    %52 = arith.mulf %50, %51 : vector<8x8xf32>
    %cst_26 = arith.constant dense<0.000000e+00> : vector<8xf32>
    %53 = vector.multi_reduction <add>, %52, %cst_26 [1] : vector<8x8xf32> to vector<8xf32>
    %54 = vector.shape_cast %53 : vector<8xf32> to vector<8x1xf32>
    %55 = vector.extract_strided_slice %19 {offsets = [0, 16], sizes = [8, 8], strides = [1, 1]} : vector<8x32xf32> to vector<8x8xf32>
    %cst_27 = arith.constant dense<0xFF800000> : vector<8xf32>
    %56 = vector.multi_reduction <maximumf>, %55, %cst_27 [1] : vector<8x8xf32> to vector<8xf32>
    %57 = vector.shape_cast %56 : vector<8xf32> to vector<8x1xf32>
    %58 = vector.broadcast %57 : vector<8x1xf32> to vector<8x8xf32>
    %59 = arith.subf %55, %58 : vector<8x8xf32>
    %60 = math.exp %59 : vector<8x8xf32>
    %cst_28 = arith.constant dense<0.000000e+00> : vector<8xf32>
    %61 = vector.multi_reduction <add>, %60, %cst_28 [1] : vector<8x8xf32> to vector<8xf32>
    %62 = vector.shape_cast %61 : vector<8xf32> to vector<8x1xf32>
    %63 = tpu.reciprocal %62 : vector<8x1xf32> -> vector<8x1xf32>
    %64 = vector.broadcast %63 : vector<8x1xf32> to vector<8x8xf32>
    %65 = arith.mulf %60, %64 : vector<8x8xf32>
    %cst_29 = arith.constant 1.000000e-03 : f32
    %66 = vector.broadcast %cst_29 : f32 to vector<8x8xf32>
    %67 = arith.maximumf %65, %66 : vector<8x8xf32>
    %68 = vector.broadcast %20 : vector<1x8xf32> to vector<8x8xf32>
    %69 = arith.mulf %67, %68 : vector<8x8xf32>
    %cst_30 = arith.constant dense<0.000000e+00> : vector<8xf32>
    %70 = vector.multi_reduction <add>, %69, %cst_30 [1] : vector<8x8xf32> to vector<8xf32>
    %71 = vector.shape_cast %70 : vector<8xf32> to vector<8x1xf32>
    %72 = vector.extract_strided_slice %19 {offsets = [0, 24], sizes = [8, 8], strides = [1, 1]} : vector<8x32xf32> to vector<8x8xf32>
    %cst_31 = arith.constant dense<0xFF800000> : vector<8xf32>
    %73 = vector.multi_reduction <maximumf>, %72, %cst_31 [1] : vector<8x8xf32> to vector<8xf32>
    %74 = vector.shape_cast %73 : vector<8xf32> to vector<8x1xf32>
    %75 = vector.broadcast %74 : vector<8x1xf32> to vector<8x8xf32>
    %76 = arith.subf %72, %75 : vector<8x8xf32>
    %77 = math.exp %76 : vector<8x8xf32>
    %cst_32 = arith.constant dense<0.000000e+00> : vector<8xf32>
    %78 = vector.multi_reduction <add>, %77, %cst_32 [1] : vector<8x8xf32> to vector<8xf32>
    %79 = vector.shape_cast %78 : vector<8xf32> to vector<8x1xf32>
    %80 = tpu.reciprocal %79 : vector<8x1xf32> -> vector<8x1xf32>
    %81 = vector.broadcast %80 : vector<8x1xf32> to vector<8x8xf32>
    %82 = arith.mulf %77, %81 : vector<8x8xf32>
    %cst_33 = arith.constant 1.000000e-03 : f32
    %83 = vector.broadcast %cst_33 : f32 to vector<8x8xf32>
    %84 = arith.maximumf %82, %83 : vector<8x8xf32>
    %85 = vector.broadcast %20 : vector<1x8xf32> to vector<8x8xf32>
    %86 = arith.mulf %84, %85 : vector<8x8xf32>
    %cst_34 = arith.constant dense<0.000000e+00> : vector<8xf32>
    %87 = vector.multi_reduction <add>, %86, %cst_34 [1] : vector<8x8xf32> to vector<8xf32>
    %88 = vector.shape_cast %87 : vector<8xf32> to vector<8x1xf32>
    %89 = tpu.concatenate %37, %54, %71, %88 in 1 : vector<8x1xf32>, vector<8x1xf32>, vector<8x1xf32>, vector<8x1xf32> -> vector<8x4xf32>
    %c0_35 = arith.constant 0 : index
    %c0_36 = arith.constant 0 : index
    %90 = vector.load %arg9[%c0_35, %c0_36] : memref<8x4xf32, #tpu.memory_space<vmem>>, vector<8x4xf32>
    tpu.vector_store %arg9[%c0_35, %c0_36], %89 {strides = array<i32>} : memref<8x4xf32, #tpu.memory_space<vmem>>, vector<8x4xf32>,
    return
  }
  func.func @transform_0(%arg0: i32) -> (i32, i32) {
    %c0_i32 = arith.constant 0 : i32
    %c0_i32_0 = arith.constant 0 : i32
    return %arg0, %c0_i32 : i32, i32
  }
  func.func @transform_1(%arg0: i32) -> (i32, i32) {
    %c0_i32 = arith.constant 0 : i32
    %c0_i32_0 = arith.constant 0 : i32
    %c0_i32_1 = arith.constant 0 : i32
    return %c0_i32, %c0_i32_0 : i32, i32
  }
  func.func @transform_2(%arg0: i32) -> (i32, i32) {
    %c0_i32 = arith.constant 0 : i32
    %c0_i32_0 = arith.constant 0 : i32
    %c0_i32_1 = arith.constant 0 : i32
    return %c0_i32, %c0_i32_0 : i32, i32
  }
  func.func @transform_3(%arg0: i32) -> (i32, i32) {
    %c0_i32 = arith.constant 0 : i32
    %c0_i32_0 = arith.constant 0 : i32
    %c0_i32_1 = arith.constant 0 : i32
    return %c0_i32, %c0_i32_0 : i32, i32
  }
  func.func @transform_4(%arg0: i32) -> (i32, i32) {
    %c0_i32 = arith.constant 0 : i32
    %c0_i32_0 = arith.constant 0 : i32
    %c0_i32_1 = arith.constant 0 : i32
    return %c0_i32, %c0_i32_0 : i32, i32
  }
  func.func @transform_5(%arg0: i32) -> (i32, i32) {
    %c0_i32 = arith.constant 0 : i32
    %c0_i32_0 = arith.constant 0 : i32
    %c0_i32_1 = arith.constant 0 : i32
    return %c0_i32, %c0_i32_0 : i32, i32
  }
  func.func @transform_6(%arg0: i32) -> (i32, i32) {
    %c0_i32 = arith.constant 0 : i32
    %c0_i32_0 = arith.constant 0 : i32
    %c0_i32_1 = arith.constant 0 : i32
    return %c0_i32, %c0_i32_0 : i32, i32
  }
  func.func @transform_7(%arg0: i32) -> (i32, i32) {
    %c0_i32 = arith.constant 0 : i32
    %c0_i32_0 = arith.constant 0 : i32
    %c0_i32_1 = arith.constant 0 : i32
    return %c0_i32, %c0_i32_0 : i32, i32
  }
  func.func @transform_8(%arg0: i32) -> (i32, i32) {
    %c0_i32 = arith.constant 0 : i32
    %c0_i32_0 = arith.constant 0 : i32
    return %arg0, %c0_i32 : i32, i32
  }
}

</mosaic_0001>

<bundles_post_ra>
// kernel: tpu_custom_call.1
= control target key start
LH: loop header
LB: loop body
LE: loop exit
PB: predicated region body
PF: predicated region fallthrough
CT: control target
= control target key end

     0   :  { %vm36_vm0 = vcmask 130048   ;;  %vm69_vm1 = vcmask 261120   ;;  %vm106_vm2 = vcmask 523264   ;;  %vm246_vm3 = vcmask 261312   ;;  %s329_s15 = smov 112   ;;  %s331_s16 = smov 104   ;;  %s472_s1 = inlined_call_operand.vmem [shape: f32[16,32], index: 1, kind: input, shape index: {}]   ;;  %s473_s0 = inlined_call_operand.vmem [shape: f32[8,16], index: 0, kind: input, shape index: {}]   ;;  %s474_s3 = inlined_call_operand.vmem [shape: f32[32,64], index: 3, kind: input, shape index: {}]   ;;  %s475_s2 = inlined_call_operand.vmem [shape: f32[1,32], index: 2, kind: input, shape index: {}]   ;;  %s476_s4 = inlined_call_operand.vmem [shape: f32[1,64], index: 4, kind: input, shape index: {}]   ;;  %s477_s5 = inlined_call_operand.vmem [shape: f32[64,32], index: 5, kind: input, shape index: {}]   ;;  %s478_s6 = inlined_call_operand.vmem [shape: f32[1,32], index: 6, kind: input, shape index: {}]   ;;  %s479_s7 = inlined_call_operand.vmem [shape: f32[1,8], index: 7, kind: input, shape index: {}]   ;;  %s480_s8 = inlined_call_operand.vmem [shape: f32[8,4], index: 8, kind: output, shape index: {}]  }
   0x1   :  { %v31_v0 = vld [vmem:[%s472_s1 + $0x8] sm:$0xff]  ;;  %v30_v1 = vld [vmem:[%s472_s1] sm:$0xff]  ;;  %v64_v3 = vld [vmem:[%s474_s3 + $0x18] sm:$0xff]  ;;  %vm164_vm4 = vcmask 130112   ;;  %vm205_vm5 = vcmask 195712   ;;  %vm131_vm6 = vcmask 64512  }
   0x2   :  { %54 = vmatpush.msra.mxu0 %v31_v0  ;;  %v29_v2 = vld [vmem:[%s473_s0] sm:$0xff]  ;;  %85 = vmatpush.msra.mxu1 %v64_v3  ;;  %v63_v4 = vld [vmem:[%s474_s3 + $0x10] sm:$0xff]  ;;  %v62_v5 = vld [vmem:[%s474_s3 + $0x8] sm:$0xff]  ;;  %s330_s1 = smov 8   ;;  %s332_s0 = smov 24  }
   0x3   :  { %v61_v6 = vld [vmem:[%s474_s3] sm:$0xff]  ;;  %v101_v7 = vld [vmem:[%s477_s5 + $0x38] sm:$0xff]  ;;  %v100_v8 = vld [vmem:[%s477_s5 + $0x30] sm:$0xff] }
   0x4   :  { %55 = vmatpush.msra.mxu0 %v30_v1  ;;  %86 = vmatpush.msra.mxu1 %v63_v4  ;;  %v99_v9 = vld [vmem:[%s477_s5 + $0x28] sm:$0xff]  ;;  %v98_v10 = vld [vmem:[%s477_s5 + $0x20] sm:$0xff]  ;;  %v97_v11 = vld [vmem:[%s477_s5 + $0x18] sm:$0xff] }
   0x5   :  { %299 = vmatmul.msk.f32.vlgmr.msra.gmra.mxu0 %vm36_vm0, %v29_v2  ;;  %118 = vmatpush.msra.mxu2 %v101_v7  ;;  %v308_v12 = vld [vmem:[%s475_s2] ss:$0 sm:$0xff]  ;;  %v96_v16 = vld [vmem:[%s477_s5 + $0x10] sm:$0xff]  ;;  %v95_v17 = vld [vmem:[%s477_s5 + $0x8] sm:$0xff] }
   0x6   :  { %87 = vmatpush.msra.mxu1 %v62_v5  ;;  %v94_v18 = vld [vmem:[%s477_s5] sm:$0xff] }
   0x7   :  { %119 = vmatpush.msra.mxu2 %v100_v8  ;;  %v309_v19 = vld [vmem:[%s476_s4] ss:$0 sm:$0xff]  ;;  %s328_s4 = smov 120  }
   0x8   :  { %88 = vmatpush.msra.mxu1 %v61_v6  ;;  %v310_v23 = vld [vmem:[%s478_s6] ss:$0 sm:$0xff] }
   0x9   :  { %120 = vmatpush.msra.mxu2 %v99_v9  ;;  %v441_v40 = vld [vmem:[%s479_s7] ss:$0 sm:$0xff]  ;;  %s333_s7 = smov 16  }
   0xb   :  { %121 = vmatpush.msra.mxu2 %v98_v10 }
   0xd   :  { %122 = vmatpush.msra.mxu2 %v97_v11 }
   0xf   :  { %123 = vmatpush.msra.mxu2 %v96_v16 }
  0x11   :  { %124 = vmatpush.msra.mxu2 %v95_v17 }
  0x13   :  { %125 = vmatpush.msra.mxu2 %v94_v18 }
  0x82   :  { %v57_v13 = vpop.f32.mrf.mxu0 }
  0x83   :  { %v58_v14 = vadd.f32 %v308_v12, %v57_v13 }
  0x85   :  { %v60_v15 = vmax.f32 %v58_v14, 0.0 }
  0x87   :  { %300 = vmatmul.msk.f32.vlgmr.msra.gmra.mxu1 %vm69_vm1, %v60_v15 }
 0x104   :  { %v90_v20 = vpop.f32.mrf.mxu1 }
 0x105   :  { %v91_v21 = vadd.f32 %v309_v19, %v90_v20 }
 0x107   :  { %v93_v22 = vmax.f32 %v91_v21, 0.0 }
 0x109   :  { %301 = vmatmul.msk.f32.vlgmr.msra.gmra.mxu2 %vm106_vm2, %v93_v22 }
 0x18c   :  { %v127_v24 = vpop.f32.mrf.mxu2 }
 0x18d   :  { %v128_v25 = vadd.f32 %v310_v23, %v127_v24 }
 0x18f   :  { %v247_v26 = vsel %vm246_vm3, %v128_v25, -inf  ;;  %v165_v27 = vsel %vm164_vm4, %v128_v25, -inf  ;;  %v206_v28 = vsel %vm205_vm5, %v128_v25, -inf  ;;  %v132_v29 = vsel %vm131_vm6, %v128_v25, -inf }
 0x190   :  { %248 = vmax.xlane.f32.xlu1 %v247_v26  ;;  %166 = vmax.xlane.f32.xlu0 %v165_v27 }
 0x198   :  { %207 = vmax.xlane.f32.xlu0 %v206_v28 }
 0x1a0   :  { %133 = vmax.xlane.f32.xlu0 %v132_v29 }
 0x203   :  { %v167_v30 = vpop.xlane.xlu0 %166  ;;  %v249_v35 = vpop.xlane.xlu1 %248 }
 0x204   :  { %v168_v31 = vsub.f32 %v128_v25, %v167_v30  ;;  %v250_v38 = vsub.f32 %v128_v25, %v249_v35 }
 0x206   :  { %v169_v32 = vmul.f32 1.442695, %v168_v31  ;;  %v251_v39 = vmul.f32 1.442695, %v250_v38 }
 0x208   :  { %312 = vpow2.f32 %v169_v32 }
 0x20b   :  { %v208_v33 = vpop.xlane.xlu0 %207 }
 0x20c   :  { %v209_v34 = vsub.f32 %v128_v25, %v208_v33 }
 0x20e   :  { %v210_v36 = vmul.f32 1.442695, %v209_v34  ;;  %v434_v37 = vpop.eup %312 }
 0x20f   :  { %172 = vrot.lane.b32.xlu1 %v434_v37, %s328_s4 }
 0x210   :  { %314 = vpow2.f32 %v210_v36 }
 0x211   :  { %316 = vpow2.f32 %v251_v39 }
 0x213   :  { %v134_v43 = vpop.xlane.xlu0 %133 }
 0x214   :  { %v135_v44 = vsub.f32 %v128_v25, %v134_v43 }
 0x216   :  { %v315_v41 = vpop.eup %314  ;;  %v136_v45 = vmul.f32 1.442695, %v135_v44 }
 0x217   :  { %213 = vrot.lane.b32.xlu2 %v315_v41, %s329_s15  ;;  %194 = vrot.lane.b32.xlu1 %v441_v40, %s330_s1  ;;  %v445_v42 = vpop.eup %316 }
 0x218   :  { %318 = vpow2.f32 %v136_v45 }
 0x21e   :  { %v450_v46 = vpop.eup %318 }
 0x21f   :  { %254 = vrot.lane.b32.xlu2 %v445_v42, %s331_s16  ;;  %276 = vrot.lane.b32.xlu1 %v441_v40, %s332_s0  ;;  %v138_v47 = vsel %vm131_vm6, %v450_v46, 0.0 }
 0x249   :  { %139 = vadd.xlane.f32.xlu1 %v138_v47 }
 0x271   :  { %v214_v48 = vpop.permute.xlu2 %213 }
 0x272   :  { %v216_v49 = vsel %vm131_vm6, %v214_v48, 0.0 }
 0x273   :  { %217 = vadd.xlane.f32.xlu0 %v216_v49 }
 0x279   :  { %v255_v50 = vpop.permute.xlu2 %254 }
 0x27a   :  { %v257_v51 = vsel %vm131_vm6, %v255_v50, 0.0 }
 0x27b   :  { %258 = vadd.xlane.f32.xlu0 %v257_v51 }
 0x281   :  { %v173_v52 = vpop.permute.xlu1 %172 }
 0x282   :  { %v175_v53 = vsel %vm131_vm6, %v173_v52, 0.0 }
 0x283   :  { %176 = vadd.xlane.f32.xlu2 %v175_v53 }
 0x289   :  { %v195_v60 = vpop.permute.xlu1 %194 }
 0x28f   :  { %235 = vrot.lane.b32.xlu0 %v441_v40, %s333_s7 }
 0x291   :  { %v277_v12 = vpop.permute.xlu1 %276 }
 0x2bc   :  { %v140_v29 = vpop.xlane.xlu1 %139 }
 0x2bd   :  { %v152_v43 = vand.u32 2147483648, %v140_v29  ;;  %vm146_vm4 = vweird.f32 %v140_v29  ;;  %v150_v44 = vand.u32 2147483647, %v140_v29 }
 0x2e6   :  { %v218_v54 = vpop.xlane.xlu0 %217 }
 0x2e7   :  { %320 = vrcp.f32 %v218_v54  ;;  %v230_v61 = vand.u32 2147483648, %v218_v54  ;;  %vm224_vm8 = vweird.f32 %v218_v54  ;;  %v228_v63 = vand.u32 2147483647, %v218_v54 }
 0x2e9   :  { %v231_v4 = vor.u32 1.1754944e-38, %v230_v61  ;;  %vm229_vm10 = vcmp.eq.f32.partialorder %v228_v63, 8.507059e+37 }
 0x2ed   :  { %v321_v55 = vpop.eup %320 }
 0x2ee   :  { %v220_v56 = vmul.f32 %v321_v55, %v218_v54  ;;  %v259_v57 = vpop.xlane.xlu0 %258  ;;  %vm225_vm7 = vweird.f32 %v321_v55 }
 0x2ef   :  { %322 = vrcp.f32 %v259_v57  ;;  %vm226_vm9 = vmor %vm224_vm8, %vm225_vm7  ;;  %v271_v6 = vand.u32 2147483648, %v259_v57  ;;  %v269_v9 = vand.u32 2147483647, %v259_v57  ;;  %vm265_vm12 = vweird.f32 %v259_v57 }
 0x2f0   :  { %v221_v58 = vsub.f32 1.0, %v220_v56  ;;  %vm151_vm7 = vcmp.eq.f32.partialorder %v150_v44, 8.507059e+37  ;;  %vm287_vm8 = vcmask 7168  }
 0x2f1   :  { %v272_v13 = vor.u32 1.1754944e-38, %v271_v6  ;;  %vm270_vm14 = vcmp.eq.f32.partialorder %v269_v9, 8.507059e+37 }
 0x2f2   :  { %v222_v59 = vmul.f32 %v321_v55, %v221_v58 }
 0x2f4   :  { %v223_v62 = vadd.f32 %v321_v55, %v222_v59 }
 0x2f5   :  { %v323_v0 = vpop.eup %322 }
 0x2f6   :  { %v261_v1 = vmul.f32 %v323_v0, %v259_v57  ;;  %v227_v2 = vsel %vm226_vm9, %v321_v55, %v223_v62  ;;  %v177_v3 = vpop.xlane.xlu2 %176  ;;  %vm266_vm11 = vweird.f32 %v323_v0  ;;  %vm289_vm9 = vcmask 15360  }
 0x2f7   :  { %324 = vrcp.f32 %v177_v3  ;;  %v232_v7 = vsel %vm229_vm10, %v231_v4, %v227_v2  ;;  %vm267_vm13 = vmor %vm265_vm12, %vm266_vm11  ;;  %v189_v21 = vand.u32 2147483648, %v177_v3  ;;  %v187_v25 = vand.u32 2147483647, %v177_v3 }
 0x2f8   :  { %v262_v5 = vsub.f32 1.0, %v261_v1  ;;  %v233_v11 = vmul.f32 %v315_v41, %v232_v7  ;;  %vm183_vm0 = vweird.f32 %v177_v3  ;;  %326 = vrcp.f32 %v140_v29 }
 0x2f9   :  { %v190_v27 = vor.u32 1.1754944e-38, %v189_v21  ;;  %vm188_vm2 = vcmp.eq.f32.partialorder %v187_v25, 8.507059e+37  ;;  %vm291_vm10 = vcmask 23552   ;;  %vm293_vm11 = vcmask 31744  }
 0x2fa   :  { %v263_v8 = vmul.f32 %v323_v0, %v262_v5  ;;  %v234_v18 = vmax.f32 %v233_v11, 0.001 }
 0x2fc   :  { %v264_v10 = vadd.f32 %v323_v0, %v263_v8 }
 0x2fd   :  { %v325_v14 = vpop.eup %324 }
 0x2fe   :  { %v268_v15 = vsel %vm267_vm13, %v323_v0, %v264_v10  ;;  %v179_v16 = vmul.f32 %v325_v14, %v177_v3  ;;  %vm184_vm15 = vweird.f32 %v325_v14  ;;  %v327_v36 = vpop.eup %326 }
 0x2ff   :  { %v273_v17 = vsel %vm270_vm14, %v272_v13, %v268_v15  ;;  %vm185_vm1 = vmor %vm183_vm0, %vm184_vm15  ;;  %v142_v38 = vmul.f32 %v327_v36, %v140_v29  ;;  %vm147_vm3 = vweird.f32 %v327_v36 }
 0x300   :  { %v180_v19 = vsub.f32 1.0, %v179_v16  ;;  %v274_v23 = vmul.f32 %v445_v42, %v273_v17  ;;  %vm148_vm5 = vmor %vm146_vm4, %vm147_vm3 }
 0x301   :  { %v236_v20 = vpop.permute.xlu0 %235  ;;  %v143_v39 = vsub.f32 1.0, %v142_v38 }
 0x302   :  { %v238_v22 = vmul.f32 %v236_v20, %v234_v18  ;;  %v181_v24 = vmul.f32 %v325_v14, %v180_v19  ;;  %v275_v28 = vmax.f32 %v274_v23, 0.001 }
 0x303   :  { %v144_v41 = vmul.f32 %v327_v36, %v143_v39 }
 0x304   :  { %240 = vrot.lane.b32.xlu0 %v238_v22, %s329_s15  ;;  %v182_v26 = vadd.f32 %v325_v14, %v181_v24  ;;  %v279_v33 = vmul.f32 %v277_v12, %v275_v28 }
 0x305   :  { %v145_v42 = vadd.f32 %v327_v36, %v144_v41 }
 0x306   :  { %v186_v30 = vsel %vm185_vm1, %v325_v14, %v182_v26 }
 0x307   :  { %v191_v31 = vsel %vm188_vm2, %v190_v27, %v186_v30  ;;  %v149_v45 = vsel %vm148_vm5, %v327_v36, %v145_v42 }
 0x308   :  { %v192_v32 = vmul.f32 %v434_v37, %v191_v31  ;;  %v153_v37 = vor.u32 1.1754944e-38, %v152_v43 }
 0x30a   :  { %v193_v34 = vmax.f32 %v192_v32, 0.001  ;;  %v154_v47 = vsel %vm151_vm7, %v153_v37, %v149_v45 }
 0x30b   :  { %v155_v48 = vmul.f32 %v450_v46, %v154_v47 }
 0x30c   :  { %281 = vrot.lane.b32.xlu0 %v279_v33, %s331_s16  ;;  %v197_v35 = vmul.f32 %v195_v60, %v193_v34 }
 0x30d   :  { %v156_v49 = vmax.f32 %v155_v48, 0.001 }
 0x30e   :  { %199 = vrot.lane.b32.xlu2 %v197_v35, %s328_s4 }
 0x30f   :  { %v160_v50 = vmul.f32 %v441_v40, %v156_v49 }
 0x311   :  { %v161_v51 = vsel %vm131_vm6, %v160_v50, 0.0 }
 0x336   :  { %162 = vadd.xlane.f32.xlu0 %v161_v51 }
 0x368   :  { %v200_v52 = vpop.permute.xlu2 %199 }
 0x369   :  { %v202_v53 = vsel %vm131_vm6, %v200_v52, 0.0 }
 0x36a   :  { %203 = vadd.xlane.f32.xlu2 %v202_v53 }
 0x376   :  { %v241_v54 = vpop.permute.xlu0 %240 }
 0x377   :  { %v243_v55 = vsel %vm131_vm6, %v241_v54, 0.0 }
 0x378   :  { %244 = vadd.xlane.f32.xlu1 %v243_v55 }
 0x37e   :  { %v282_v56 = vpop.permute.xlu0 %281 }
 0x37f   :  { %v284_v57 = vsel %vm131_vm6, %v282_v56, 0.0 }
 0x380   :  { %285 = vadd.xlane.f32.xlu1 %v284_v57 }
 0x3a9   :  { %v163_v40 = vpop.xlane.xlu0 %162 }
 0x3dd   :  { %v204_v46 = vpop.xlane.xlu2 %203 }
 0x3de   :  { %v288_v59 = vsel %vm287_vm8, %v163_v40, %v204_v46 }
 0x3eb   :  { %v245_v58 = vpop.xlane.xlu1 %244 }
 0x3ec   :  { %v290_v60 = vsel %vm289_vm9, %v288_v59, %v245_v58 }
 0x3f3   :  { %v286_v61 = vpop.xlane.xlu1 %285 }
 0x3f4   :  { %v292_v62 = vsel %vm291_vm10, %v290_v60, %v286_v61 }
 0x3f5   :  { %294 = vst.msk [vmem:[%s480_s8] sm:$0xff] %vm293_vm11, %v292_v62 }

</bundles_post_ra>
